<compile_context>
chip_gen: v7x
topology: tpu7x:2x2x1
jax: 0.10.0
libtpu: 0.0.40
codegen_flags: <defaults>
</compile_context>

<pallas_src>
import jax
import jax.numpy as jnp
from jax.experimental import pallas as pl
from jax.experimental.pallas import tpu as pltpu


def channel_attention_kernel(g_ref, f_ref, p1_ref, p2_ref, out_ref):
    # g_ref / f_ref / out_ref : (TB, C, N)
    # p1_ref : (C + 1, 2H)   = [w1a.T | w1b.T] over rows 0..C-1, bias row last
    # p2_ref : (2H + 1, 2C)  = block-diag [w2a.T, w2b.T], bias row last
    g = g_ref[...]                               # (TB, C, N)
    f = f_ref[...]                               # (TB, C, N)
    tb, c, n = g.shape
    h2 = p2_ref.shape[0] - 1                     # 2H

    # features_U = g + f ; feat_pool = mean over N  -> (TB, C)
    s = g + f
    pool = jnp.sum(s, axis=-1) * (1.0 / n)       # (TB, C)

    # Fused first Linear of both branches: (TB, C) @ (C, 2H) + bias, ReLU.
    w1t = p1_ref[:c, :]                          # (C, 2H)
    b1 = p1_ref[c:c + 1, :]                      # (1, 2H)
    hidden = jnp.maximum(
        jnp.dot(pool, w1t, preferred_element_type=jnp.float32) + b1, 0.0
    )                                            # (TB, 2H)

    # Fused second Linear (block-diagonal so branches stay independent):
    # (TB, 2H) @ (2H, 2C) + bias -> [alpha | beta] as (TB, 2C).
    w2t = p2_ref[:h2, :]                         # (2H, 2C)
    b2 = p2_ref[h2:h2 + 1, :]                    # (1, 2C)
    ab = jnp.dot(hidden, w2t, preferred_element_type=jnp.float32) + b2

    alpha = ab[:, :c]                            # (TB, C)
    beta = ab[:, c:]                             # (TB, C)

    # Numerically stable 2-way softmax per (batch, channel).
    m = jnp.maximum(alpha, beta)
    ea = jnp.exp(alpha - m)
    eb = jnp.exp(beta - m)
    denom = ea + eb
    # EUP approximate reciprocal + one Newton refinement -> full f32 accuracy
    # without a VPU divide (the array is only (TB, C), so this is ~free).
    inv = pl.reciprocal(denom, approx=True)
    inv = inv * (2.0 - denom * inv)

    wa = (ea * inv)[:, :, None]                  # (TB, C, 1)
    wb = (eb * inv)[:, :, None]                  # (TB, C, 1)

    # Weighted blend — the only real per-element work (HBM-bound).
    out_ref[...] = (wa * g + wb * f).astype(out_ref.dtype)


def _choose_batch_block(B, C, N, block_budget_bytes):
    """Largest divisor of B whose (g, f, out) double-buffered blocks fit the
    VMEM budget; keep the grid >= 2 steps when possible (v7x megacore)."""
    per_b = 6 * C * N * 4                        # 3 arrays x 2 buffers x f32
    max_tb = max(1, block_budget_bytes // per_b)
    tb = 1
    for d in range(1, B + 1):
        if B % d == 0 and d <= max_tb:
            tb = d
    if tb == B and B > 1:                        # leave >= 2 grid steps
        for d in range(B - 1, 0, -1):
            if B % d == 0 and d <= max_tb:
                tb = d
                break
    return tb


def channel_attention(g, f, params, *, block_budget_bytes=24 << 20):
    """g, f: (B, C, N) float32. params: dict of fc_1 / fc_2 weights
    (nn.Linear convention: weight (out, in), bias (out,))."""
    B, C, N = g.shape
    H = params["w1a"].shape[0]

    # --- Pack the 8 parameter arrays into 2 dense constant slabs ------------
    # p1 = [[w1a.T | w1b.T],     (C, 2H)
    #       [ b1a  |  b1b ]]     (1, 2H)    -> (C+1, 2H)
    w1t = jnp.concatenate([params["w1a"].T, params["w1b"].T], axis=1)
    b1 = jnp.concatenate([params["b1a"], params["b1b"]]).reshape(1, 2 * H)
    p1 = jnp.concatenate([w1t, b1], axis=0).astype(jnp.float32)

    # p2 = [[w2a.T |   0  ],     (H, 2C)
    #       [  0   | w2b.T],     (H, 2C)
    #       [ b2a  |  b2b ]]     (1, 2C)    -> (2H+1, 2C)
    z = jnp.zeros((H, C), jnp.float32)
    w2t = jnp.concatenate(
        [jnp.concatenate([params["w2a"].T, z], axis=1),
         jnp.concatenate([z, params["w2b"].T], axis=1)],
        axis=0,
    )
    b2 = jnp.concatenate([params["b2a"], params["b2b"]]).reshape(1, 2 * C)
    p2 = jnp.concatenate([w2t, b2], axis=0).astype(jnp.float32)

    # --- Tiling --------------------------------------------------------------
    # N stays un-tiled (the mean reduction needs the full row); C stays full.
    # TODO(synk): if a single (C, N) slab ever exceeds a few MiB, split into a
    # two-pass (pool/MLP, then blend over N tiles) structure.
    tb = _choose_batch_block(B, C, N, block_budget_bytes)
    grid = (B // tb,)

    feat_spec = pl.BlockSpec((tb, C, N), lambda i: (i, 0, 0))
    p1_spec = pl.BlockSpec((C + 1, 2 * H), lambda i: (0, 0))
    p2_spec = pl.BlockSpec((2 * H + 1, 2 * C), lambda i: (0, 0))

    bytes_accessed = 3 * B * C * N * 4 + (p1.size + p2.size) * 4
    flops = 4 * B * C * N + 2 * B * (C * 2 * H + 2 * H * 2 * C)
    cost = pl.CostEstimate(
        flops=flops,
        transcendentals=2 * B * C,
        bytes_accessed=bytes_accessed,
    )

    return pl.pallas_call(
        channel_attention_kernel,
        out_shape=jax.ShapeDtypeStruct((B, C, N), jnp.float32),
        grid=grid,
        in_specs=[feat_spec, feat_spec, p1_spec, p2_spec],
        out_specs=feat_spec,
        compiler_params=pltpu.CompilerParams(
            dimension_semantics=("parallel",),
            vmem_limit_bytes=48 << 20,   # > v5e/v6e default scoped limit, < v7x physical
        ),
        cost_estimate=cost,
    )(g, f, p1, p2)


def channel_attention_ref(g, f, params):
    """Pure-JAX reference mirroring the PyTorch forward."""
    pool = jnp.mean(g + f, axis=-1)                                   # (B, C)

    def mlp(x, w1, b1, w2, b2):
        h = jnp.maximum(x @ w1.T + b1, 0.0)
        return h @ w2.T + b2

    alpha = mlp(pool, params["w1a"], params["b1a"], params["w2a"], params["b2a"])
    beta = mlp(pool, params["w1b"], params["b1b"], params["w2b"], params["b2b"])
    w = jax.nn.softmax(jnp.stack([alpha, beta], axis=1), axis=1)      # (B, 2, C)
    return w[:, 0, :, None] * g + w[:, 1, :, None] * f


if __name__ == "__main__":
    B, C, N = 8, 16, 128        # batch, channels, sequence/spatial
    reduction = 4
    H = C // reduction

    key = jax.random.PRNGKey(0)
    keys = jax.random.split(key, 10)

    g = jax.random.normal(keys[0], (B, C, N), dtype=jnp.float32)
    f = jax.random.normal(keys[1], (B, C, N), dtype=jnp.float32)

    # nn.Linear convention: weight (out, in), bias (out,).
    params = {
        "w1a": jax.random.normal(keys[2], (H, C), jnp.float32) * 0.1,
        "b1a": jax.random.normal(keys[3], (H,), jnp.float32) * 0.1,
        "w2a": jax.random.normal(keys[4], (C, H), jnp.float32) * 0.1,
        "b2a": jax.random.normal(keys[5], (C,), jnp.float32) * 0.1,
        "w1b": jax.random.normal(keys[6], (H, C), jnp.float32) * 0.1,
        "b1b": jax.random.normal(keys[7], (H,), jnp.float32) * 0.1,
        "w2b": jax.random.normal(keys[8], (C, H), jnp.float32) * 0.1,
        "b2b": jax.random.normal(keys[9], (C,), jnp.float32) * 0.1,
    }

    out = channel_attention(g, f, params)
    out = jax.block_until_ready(out)

    ref = channel_attention_ref(g, f, params)
    assert out.shape == (B, C, N)
    # Tolerance slightly looser than pure-f32 because the softmax denominator
    # uses the EUP approximate reciprocal (refined by one Newton step).
    assert jnp.allclose(out, ref, atol=1e-3, rtol=1e-3), "mismatch vs reference"

    print("KERNEL_OK")
</pallas_src>

<mosaic_0001>
module attributes {stable_mosaic.version = 11 : i64} {
  func.func @channel_attention_kernel(%arg0: i32, %arg1: memref<4x16x128xf32, #tpu.memory_space<vmem>>, %arg2: memref<4x16x128xf32, #tpu.memory_space<vmem>>, %arg3: memref<17x8xf32, #tpu.memory_space<vmem>>, %arg4: memref<9x32xf32, #tpu.memory_space<vmem>>, %arg5: memref<4x16x128xf32, #tpu.memory_space<vmem>>) attributes {dimension_semantics = [#tpu.dimension_semantics<parallel>], iteration_bounds = array<i64: 2>, scalar_prefetch = 0 : i64, scratch_operands = 0 : i64, tpu.core_type = #tpu.core_type<tc>, window_params = [{transform_indices = @transform_0, window_bounds = array<i64: 4, 16, 128>}, {transform_indices = @transform_1, window_bounds = array<i64: 4, 16, 128>}, {pipeline_mode = #tpu.pipeline_mode<synchronous>, transform_indices = @transform_2, window_bounds = array<i64: 17, 8>}, {pipeline_mode = #tpu.pipeline_mode<synchronous>, transform_indices = @transform_3, window_bounds = array<i64: 9, 32>}, {transform_indices = @transform_4, window_bounds = array<i64: 4, 16, 128>}]} {
    %c0 = arith.constant 0 : index
    %c0_0 = arith.constant 0 : index
    %c0_1 = arith.constant 0 : index
    %0 = vector.load %arg1[%c0, %c0_0, %c0_1] : memref<4x16x128xf32, #tpu.memory_space<vmem>>, vector<4x16x128xf32>
    %c0_2 = arith.constant 0 : index
    %c0_3 = arith.constant 0 : index
    %c0_4 = arith.constant 0 : index
    %1 = vector.load %arg2[%c0_2, %c0_3, %c0_4] : memref<4x16x128xf32, #tpu.memory_space<vmem>>, vector<4x16x128xf32>
    %2 = arith.addf %0, %1 : vector<4x16x128xf32>
    %cst = arith.constant dense<0.000000e+00> : vector<4x16xf32>
    %3 = vector.multi_reduction <add>, %2, %cst [2] : vector<4x16x128xf32> to vector<4x16xf32>
    %cst_5 = arith.constant 7.812500e-03 : f32
    %4 = vector.broadcast %cst_5 : f32 to vector<4x16xf32>
    %5 = arith.mulf %3, %4 : vector<4x16xf32>
    %c0_6 = arith.constant 0 : index
    %c0_7 = arith.constant 0 : index
    %6 = vector.load %arg3[%c0_6, %c0_7] : memref<17x8xf32, #tpu.memory_space<vmem>>, vector<16x8xf32>
    %c16 = arith.constant 16 : index
    %c0_8 = arith.constant 0 : index
    %7 = vector.load %arg3[%c16, %c0_8] : memref<17x8xf32, #tpu.memory_space<vmem>>, vector<1x8xf32>
    %cst_9 = arith.constant dense<0.000000e+00> : vector<4x8xf32>
    %8 = tpu.matmul %5, %6, %cst_9 {dimension_numbers = #tpu.dot_dimension_numbers<[1], [0], [0], [1], [0, 0, 1, 1], [], []>} : vector<4x16xf32>, vector<16x8xf32>, vector<4x8xf32> -> vector<4x8xf32>
    %9 = vector.broadcast %7 : vector<1x8xf32> to vector<4x8xf32>
    %10 = arith.addf %8, %9 : vector<4x8xf32>
    %cst_10 = arith.constant 0.000000e+00 : f32
    %11 = vector.broadcast %cst_10 : f32 to vector<4x8xf32>
    %12 = arith.maximumf %10, %11 : vector<4x8xf32>
    %c0_11 = arith.constant 0 : index
    %c0_12 = arith.constant 0 : index
    %13 = vector.load %arg4[%c0_11, %c0_12] : memref<9x32xf32, #tpu.memory_space<vmem>>, vector<8x32xf32>
    %c8 = arith.constant 8 : index
    %c0_13 = arith.constant 0 : index
    %14 = vector.load %arg4[%c8, %c0_13] : memref<9x32xf32, #tpu.memory_space<vmem>>, vector<1x32xf32>
    %cst_14 = arith.constant dense<0.000000e+00> : vector<4x32xf32>
    %15 = tpu.matmul %12, %13, %cst_14 {dimension_numbers = #tpu.dot_dimension_numbers<[1], [0], [0], [1], [0, 0, 1, 1], [], []>} : vector<4x8xf32>, vector<8x32xf32>, vector<4x32xf32> -> vector<4x32xf32>
    %16 = vector.broadcast %14 : vector<1x32xf32> to vector<4x32xf32>
    %17 = arith.addf %15, %16 : vector<4x32xf32>
    %18 = vector.extract_strided_slice %17 {offsets = [0, 0], sizes = [4, 16], strides = [1, 1]} : vector<4x32xf32> to vector<4x16xf32>
    %19 = vector.extract_strided_slice %17 {offsets = [0, 16], sizes = [4, 16], strides = [1, 1]} : vector<4x32xf32> to vector<4x16xf32>
    %20 = arith.maximumf %18, %19 : vector<4x16xf32>
    %21 = arith.subf %18, %20 : vector<4x16xf32>
    %22 = math.exp %21 : vector<4x16xf32>
    %23 = arith.subf %19, %20 : vector<4x16xf32>
    %24 = math.exp %23 : vector<4x16xf32>
    %25 = arith.addf %22, %24 : vector<4x16xf32>
    %26 = tpu.reciprocal %25 {approx = true} : vector<4x16xf32> -> vector<4x16xf32>
    %27 = arith.mulf %25, %26 : vector<4x16xf32>
    %cst_15 = arith.constant 2.000000e+00 : f32
    %28 = vector.broadcast %cst_15 : f32 to vector<4x16xf32>
    %29 = arith.subf %28, %27 : vector<4x16xf32>
    %30 = arith.mulf %26, %29 : vector<4x16xf32>
    %31 = arith.mulf %22, %30 : vector<4x16xf32>
    %32 = vector.shape_cast %31 : vector<4x16xf32> to vector<4x16x1xf32>
    %33 = arith.mulf %24, %30 : vector<4x16xf32>
    %34 = vector.shape_cast %33 : vector<4x16xf32> to vector<4x16x1xf32>
    %35 = vector.broadcast %32 : vector<4x16x1xf32> to vector<4x16x128xf32>
    %36 = arith.mulf %35, %0 : vector<4x16x128xf32>
    %37 = vector.broadcast %34 : vector<4x16x1xf32> to vector<4x16x128xf32>
    %38 = arith.mulf %37, %1 : vector<4x16x128xf32>
    %39 = arith.addf %36, %38 : vector<4x16x128xf32>
    %c0_16 = arith.constant 0 : index
    %c0_17 = arith.constant 0 : index
    %c0_18 = arith.constant 0 : index
    %40 = vector.load %arg5[%c0_16, %c0_17, %c0_18] : memref<4x16x128xf32, #tpu.memory_space<vmem>>, vector<4x16x128xf32>
    tpu.vector_store %arg5[%c0_16, %c0_17, %c0_18], %39 {strides = array<i32>} : memref<4x16x128xf32, #tpu.memory_space<vmem>>, vector<4x16x128xf32>,
    return
  }
  func.func @transform_0(%arg0: i32) -> (i32, i32, i32) {
    %c0_i32 = arith.constant 0 : i32
    %c0_i32_0 = arith.constant 0 : i32
    %c0_i32_1 = arith.constant 0 : i32
    return %arg0, %c0_i32, %c0_i32_0 : i32, i32, i32
  }
  func.func @transform_1(%arg0: i32) -> (i32, i32, i32) {
    %c0_i32 = arith.constant 0 : i32
    %c0_i32_0 = arith.constant 0 : i32
    %c0_i32_1 = arith.constant 0 : i32
    return %arg0, %c0_i32, %c0_i32_0 : i32, i32, i32
  }
  func.func @transform_2(%arg0: i32) -> (i32, i32) {
    %c0_i32 = arith.constant 0 : i32
    %c0_i32_0 = arith.constant 0 : i32
    %c0_i32_1 = arith.constant 0 : i32
    return %c0_i32, %c0_i32_0 : i32, i32
  }
  func.func @transform_3(%arg0: i32) -> (i32, i32) {
    %c0_i32 = arith.constant 0 : i32
    %c0_i32_0 = arith.constant 0 : i32
    %c0_i32_1 = arith.constant 0 : i32
    return %c0_i32, %c0_i32_0 : i32, i32
  }
  func.func @transform_4(%arg0: i32) -> (i32, i32, i32) {
    %c0_i32 = arith.constant 0 : i32
    %c0_i32_0 = arith.constant 0 : i32
    %c0_i32_1 = arith.constant 0 : i32
    return %arg0, %c0_i32, %c0_i32_0 : i32, i32, i32
  }
}

</mosaic_0001>

<bundles_post_ra>
// kernel: tpu_custom_call.1
= control target key start
LH: loop header
LB: loop body
LE: loop exit
PB: predicated region body
PF: predicated region fallthrough
CT: control target
= control target key end

     0   :  { %9 = vsyncpa [#allocation3], 0  ;;  %s1415_s0 = inlined_call_operand.hbm [shape: f32[8,16,128], index: 0, kind: input, shape index: {}]   ;;  %s1416_s1 = inlined_call_operand.hbm [shape: f32[8,16,128], index: 1, kind: input, shape index: {}]   ;;  %s1417_s2 = inlined_call_operand.vmem [shape: f32[17,8], index: 2, kind: input, shape index: {}]   ;;  %s1418_s3 = inlined_call_operand.vmem [shape: f32[9,32], index: 3, kind: input, shape index: {}]   ;;  %s1419_s4 = inlined_call_operand.hbm [shape: f32[8,16,128], index: 4, kind: output, shape index: {}]  }
   0x1   :  { %11 = vsyncpa [#allocation3 + $0x1], 0 }
   0x2   :  { %12 = vsyncpa [#allocation6], 0 }
   0x3   :  { %14 = vsyncpa [#allocation6 + $0x1], 0 }
   0x4   :  { %15 = vsyncpa [#allocation4], 0 }
   0x5   :  { %17 = vsyncpa [#allocation4 + $0x1], 0  ;;  %s1075_s15 = smov 0   ;;  %s1077_s16 = smov 0  }
   0x6   :  { %s1079_s17 = smov 0   ;;  %s1081_s18 = smov 0  }
   0x7 LB: > { %s1096_s19 = sadd.s32 4294967295, %s1036_s18   ;;  %s789_s20 = sadd.s32 4294967294, %s1036_s18   ;;  %s1036_s18 = sphi %s1081_s18, %s1435_s18   ;;  %s1032_s17 = sphi %s1079_s17, %s1434_s17   ;;  %s1028_s16 = sphi %s1077_s16, %s1433_s16   ;;  %s1024_s15 = sphi %s1075_s15, %s1432_s15  }
   0x8   : > { %s1100_s21 = sadd.s32 1, %s1036_s18   ;;  %s30_s22 = sadd.s32 1, %s1032_s17 }
   0x9   : > { %s27_s23 = ssub.s32 %s1036_s18, %s1100_s21  ;;  %p37_p0 = scmp.ne.s32.totalorder %s1032_s17, %s1028_s16 }
   0xa   : > { %p28_p1 = scmp.eq.s32.totalorder %s27_s23, 0  ;;  %p38_p2 = scmp.eq.s32.totalorder %s1036_s18, 0 }
   0xb   : > { %p43_p3 = scmp.ne.s32.totalorder %s1028_s16, %s1024_s15  ;;  %p44_p4 = scmp.eq.s32.totalorder %s1096_s19, 0 }
   0xc   : > { %s1112_s24 = scalar_select %p28_p1, %s1032_s17, %s30_s22  }
   0xd   : > { %p1114_p5 = por %p38_p2, %p37_p0  ;;  %p1118_p6 = por %p44_p4, %p43_p3 }
   0xe   : > { %p135_p7 = scmp.eq.s32.totalorder %s1096_s19, 1  ;;  %p141_p8 = scmp.eq.s32.totalorder %s789_s20, 1 }
   0xf   : > { %s1423_s26 = scalar_select %p1118_p6, 1, 0 }
  0x10   : > { %p857_p10 = scmp.lt.s32.totalorder %s1036_s18, 2  ;;  %p1125_p11 = por %p135_p7, %p37_p0 }
  0x11   : > { %p1129_p12 = por %p141_p8, %p43_p3  ;;  %s1134_s29 = sand.u32 1, %s1032_s17  }
  0x12   : > { %s1424_s27 = scalar_select %p1125_p11, 1, 0 }
  0x13   : > { %s1425_s28 = scalar_select %p1129_p12, 1, 0 }
  0x14   : > { %s815_s30 = sshll.u32 %s1036_s18, 10  ;;  %s792_s5 = sshll.u32 %s1134_s29, 6 }
  0x15   : > { %s1143_s8 = scalar_lea.hbm %s1415_s0, %s815_s30  ;;  %s171_s9 = scalar_lea.vmem [#allocation2], %s792_s5 }
  0x16   : > { %s179_s10 = sshll.u32 %s171_s9, 4  ;;  %p1149_p13 = pnand %p857_p10, %p1114_p5  ;;  %s1153_s10 = int_to_ptr.vmem [resolvable:$true] %s179_s10 }
  0x17   : > { %s168_s12 = scalar_lea.sflag [#allocation3], %s1134_s29  ;;  %s906_s13 = scalar_lea.hbm %s1143_s8, 1024 }
  0x18   : > { %p907_p0 = scmp.ne.s32.totalorder %s1143_s8, %s906_s13  ;;  %p908_p1 = pneg %p1149_p13 }
  0x19   : > { %s911_s22 = scalar_lea.hbm %s1415_s0, 2048  ;;  %p912_p4 = scmp.lt.u32.totalorder %s1143_s8, %s1415_s0 }
  0x1a   : > { %p909_p2 = pnand %p908_p1, %p907_p0  ;;  %p913_p5 = scmp.lt.u32.totalorder %s911_s22, %s906_s13 }
  0x1b   : > { %p915_p8 = scmp.lt.u32.totalorder %s906_s13, %s1143_s8 }
  0x1c   : > { %p910_p3 = pneg %p909_p2  ;;  %p914_p7 = por %p913_p5, %p912_p4 }
  0x1e   : > { %p916_p10 = por %p915_p8, %p914_p7 }
  0x20   : > { %p917_p9 = pnand %p916_p10, %p910_p3 }
  0x22   : > { %920 = shalt.err (!%p917_p9)
}
  0x23   : > { %s921_s6 = scalar_lea.vmem %s1153_s10, 1024  ;;  %s1038_s7 = smov [#allocation2]  }
  0x24   : > { %p922_p0 = scmp.ne.s32.totalorder %s1153_s10, %s921_s6  ;;  %s926_s9 = sshll.u32 %s1038_s7, 4  ;;  %s927_s9 = int_to_ptr.vmem [resolvable:$false] %s926_s9 }
  0x25   : > { %s928_s14 = scalar_lea.vmem %s927_s9, 2048  ;;  %p929_p11 = scmp.lt.s32.totalorder %s1153_s10, %s927_s9 }
  0x26   : > { %p924_p2 = pnand %p922_p0, %p908_p1  ;;  %p930_p4 = scmp.lt.s32.totalorder %s928_s14, %s921_s6 }
  0x28   : > { %p925_p12 = pneg %p924_p2  ;;  %p931_p5 = por %p930_p4, %p929_p11 }
  0x2a   : > { %p932_p7 = pnand %p931_p5, %p925_p12 }
  0x2c   : > { %935 = shalt.err (!%p932_p7)
}
  0x2d   : > { %s1039_s13 = smov 128   ;;  %s1040_s20 = smov 8  }
  0x2e   : > { %849 = dma.hbm_to_vmem [thread:$0]  (!%p1149_p13), %s1143_s8, 1024, %s1153_s10, %s168_s12, %s1039_s13, %s1039_s13, %s1040_s20  }
  0x2f   : > { %p800_p9 = scmp.ge.s32.totalorder %s1036_s18, 1  ;;  %p209_p11 = scmp.lt.s32.totalorder %s1036_s18, 3 }
  0x30   : > { %s1197_s6 = scalar_lea.hbm %s1416_s1, %s815_s30  ;;  %s193_s7 = scalar_lea.vmem [#allocation5], %s792_s5 }
  0x31   : > { %p1188_p12 = pnand %p800_p9, %p209_p11  ;;  %s201_s9 = sshll.u32 %s193_s7, 4  ;;  %s1201_s9 = int_to_ptr.vmem [resolvable:$true] %s201_s9 }
  0x32   : > { %s190_s8 = scalar_lea.sflag [#allocation6], %s1134_s29  ;;  %s936_s10 = scalar_lea.hbm %s1197_s6, 1024 }
  0x33   : > { %p937_p3 = scmp.ne.s32.totalorder %s1197_s6, %s936_s10  ;;  %s941_s30 = scalar_lea.hbm %s1416_s1, 2048 }
  0x34   : > { %p942_p0 = scmp.lt.u32.totalorder %s1197_s6, %s1416_s1  ;;  %p943_p2 = scmp.lt.u32.totalorder %s941_s30, %s936_s10 }
  0x35   : > { %p939_p8 = pnand %p937_p3, %p908_p1  ;;  %p945_p5 = scmp.lt.u32.totalorder %s936_s10, %s1197_s6 }
  0x36   : > { %p944_p4 = por %p943_p2, %p942_p0 }
  0x37   : > { %p940_p10 = pneg %p939_p8 }
  0x38   : > { %p946_p7 = por %p945_p5, %p944_p4 }
  0x3a   : > { %p947_p9 = pnand %p946_p7, %p940_p10 }
  0x3c   : > { %950 = shalt.err (!%p947_p9)
}
  0x3d   : > { %s951_s5 = scalar_lea.vmem %s1201_s9, 1024  ;;  %s1041_s7 = smov [#allocation5]  }
  0x3e   : > { %p952_p11 = scmp.ne.s32.totalorder %s1201_s9, %s951_s5  ;;  %s956_s12 = sshll.u32 %s1041_s7, 4  ;;  %s957_s12 = int_to_ptr.vmem [resolvable:$false] %s956_s12 }
  0x3f   : > { %s958_s14 = scalar_lea.vmem %s957_s12, 2048  ;;  %p959_p6 = scmp.lt.s32.totalorder %s1201_s9, %s957_s12 }
  0x40   : > { %p954_p3 = pnand %p952_p11, %p908_p1  ;;  %p960_p0 = scmp.lt.s32.totalorder %s958_s14, %s951_s5 }
  0x42   : > { %p955_p8 = pneg %p954_p3  ;;  %p961_p2 = por %p960_p0, %p959_p6 }
  0x44   : > { %p962_p4 = pnand %p961_p2, %p955_p8 }
  0x46   : > { %965 = shalt.err (!%p962_p4)
}
  0x47   : > { %852 = dma.hbm_to_vmem [thread:$0]  (!%p1149_p13), %s1197_s6, 1024, %s1201_s9, %s190_s8, %s1039_s13, %s1039_s13, %s1040_s20  }
  0x48   : > { %213 = sbr.rel (%p1188_p12) target bundleno = 1322 (0x52a), region = 36  ;;  %s1235_s10 = sand.u32 (!%p1188_p12), 1, %s1028_s16  }
  0x49   : > { %s1238_s30 = sshll.u32 (!%p1188_p12), %s1235_s10, 6  ;;  %s216_s11 = scalar_lea.sflag (!%p1188_p12), [#allocation3], %s1235_s10 }
  0x4a   : > { %s1242_s23 = scalar_lea.vmem (!%p1188_p12), [#allocation2], %s1238_s30  ;;  %p1428_p6 = scmp.ne.s32.totalorder (!%p1188_p12), %s1423_s26, 0 }
  0x4f   : > { %1011 = dma.done.wait (%p1428_p6), %s216_s11, 1024  }
  0x50   : > { %1013 = vsyncadd (%p1428_p6), %s216_s11, 4294966272  ;;  %s225_s29 = scalar_lea.sflag [#allocation6], %s1235_s10  ;;  %s228_s13 = scalar_lea.vmem [#allocation5], %s1238_s30 }
  0x51   : > { %1015 = dma.done.wait (%p1428_p6), %s225_s29, 1024  }
  0x52   : > { %1017 = vsyncadd (%p1428_p6), %s225_s29, 4294966272  ;;  %v1255_v0 = vld [vmem:[%s1242_s23 + $0x10] sm:$0xff]  ;;  %v1260_v2 = vld [vmem:[%s1242_s23] sm:$0xff]  ;;  %v1042_v27 = vmov 0.0|0.0   ;;  %vm1043_vm0 = vmmov 0   ;;  %v1044_v28 = vmov 0.0   ;;  %v324_v29 = vlaneseq }
  0x53   : > { %v1257_v1 = vld [vmem:[%s228_s13 + $0x10] sm:$0xff]  ;;  %v1264_v4 = vld [vmem:[%s228_s13] sm:$0xff]  ;;  %v1267_v5 = vld [vmem:[%s1242_s23 + $0x18] sm:$0xff]  ;;  %837 = vmatprep.subr.bf16.mxu0 %v1042_v27  ;;  %829 = vmatprep.mubr.msk.f32.mxu0 %vm1043_vm0, %v1044_v28  ;;  %vm335_vm1 = vcmask 130112   ;;  %vm364_vm2 = vcmask 1041409   ;;  %vm366_vm3 = vcmask 1042434  }
  0x54   : > { %v279_v3 = vadd.f32 %v1257_v1, %v1255_v0  ;;  %v1269_v6 = vld [vmem:[%s228_s13 + $0x18] sm:$0xff]  ;;  %v277_v7 = vadd.f32 %v1264_v4, %v1260_v2  ;;  %v1274_v8 = vld [vmem:[%s1242_s23 + $0x8] sm:$0xff]  ;;  %v1288_v14 = vld [vmem:[%s1242_s23 + $0x20] sm:$0xff]  ;;  %832 = vmatprep.subr.mxu1 %v1044_v28  ;;  %834 = vmatprep.mubr.msk.f32.mxu1 %vm1043_vm0, %v1044_v28  ;;  %v325_v30 = vand.u32 127, %v324_v29  ;;  %v1316_v34 = vshrl.u32 %v324_v29, 7  ;;  %s1045_s14 = smov 112  }
  0x55   : > { %v1276_v9 = vld [vmem:[%s228_s13 + $0x8] sm:$0xff]  ;;  %v280_v10 = vadd.f32 %v1269_v6, %v1267_v5  ;;  %v1290_v15 = vld [vmem:[%s228_s13 + $0x20] sm:$0xff]  ;;  %v1297_v18 = vld [vmem:[%s1242_s23 + $0x38] sm:$0xff]  ;;  %vm368_vm4 = vcmask 1043459   ;;  %vm370_vm5 = vcmask 130048   ;;  %vm450_vm6 = vcmask 64512  }
  0x56   : > { %289 = vadd.xlane.f32.xlu1 %v279_v3  ;;  %285 = vadd.xlane.f32.xlu0 %v277_v7  ;;  %v278_v11 = vadd.f32 %v1276_v9, %v1274_v8  ;;  %v1283_v12 = vld [vmem:[%s1242_s23 + $0x28] sm:$0xff]  ;;  %v281_v17 = vadd.f32 %v1290_v15, %v1288_v14  ;;  %v1299_v19 = vld [vmem:[%s228_s13 + $0x38] sm:$0xff]  ;;  %v1302_v20 = vld [vmem:[%s1242_s23 + $0x30] sm:$0xff]  ;;  %v330_v33 = vadd.s32 4294967288, %v325_v30  ;;  %v328_v40 = vsub.s32 %v325_v30, %v1316_v34  ;;  %s1046_s11 = smov 16   ;;  %s1344_s23 = scalar_lea.vmem [#allocation7], %s1238_s30 }
  0x57   : > { %v1285_v13 = vld [vmem:[%s228_s13 + $0x28] sm:$0xff]  ;;  %v1304_v21 = vld [vmem:[%s228_s13 + $0x30] sm:$0xff]  ;;  %v284_v22 = vadd.f32 %v1299_v19, %v1297_v18  ;;  %v309_v24 = vld [vmem:[%s1417_s2] sm:$0xff]  ;;  %s693_s30 = sshll.u32 %s1344_s23, 4  ;;  %s819_s29 = sshll.u32 %s1096_s19, 10  ;;  %s1360_s30 = int_to_ptr.vmem [resolvable:$true] %s693_s30 }
  0x58   : > { %v282_v16 = vadd.f32 %v1285_v13, %v1283_v12  ;;  %v283_v23 = vadd.f32 %v1304_v21, %v1302_v20  ;;  %v310_v25 = vld [vmem:[%s1417_s2 + $0x8] sm:$0xff]  ;;  %v333_v37 = vsub.s32 %v330_v33, %v1316_v34  ;;  %s1369_s26 = scalar_lea.hbm %s1419_s4, %s819_s29  ;;  %s679_s20 = scalar_lea.sflag [#allocation4], %s1235_s10 }
  0x59   : > { %v838_v26 = vpack.c.bf16 %v310_v25, %v309_v24  ;;  %v806_v24 = vld [vmem:[%s1418_s3 + $0x8] ss:$0 sm:$0xff]  ;;  %s966_s22 = scalar_lea.vmem %s1360_s30, 1024  ;;  %p1429_p1 = scmp.ne.s32.totalorder %s1424_s27, 0 }
  0x5a   : > { %291 = vadd.xlane.f32.xlu1 %v280_v10  ;;  %287 = vadd.xlane.f32.xlu0 %v278_v11  ;;  %v444_v10 = vld [vmem:[%s1418_s3] sm:$0xff]  ;;  %v804_v11 = vld [vmem:[%s1417_s2 + $0x10] ss:$0 sm:$0xff]  ;;  %p967_p13 = scmp.ne.s32.totalorder %s1360_s30, %s966_s22  ;;  %s1047_s6 = smov [#allocation7]  }
  0x5b   : > { %839 = vmatpush3.bf16.msra.mxu0 %v838_v26  ;;  %833 = vmatpush3.msra.mxu1 %v444_v10  ;;  %s970_s9 = sshll.u32 %s1047_s6, 4  ;;  %s971_s9 = int_to_ptr.vmem [resolvable:$false] %s970_s9 }
  0x5c   : > { %p968_p12 = pnand %p967_p13, %p1429_p1  ;;  %s972_s8 = scalar_lea.vmem %s971_s9, 2048 }
  0x5d   : > { %p973_p5 = scmp.lt.s32.totalorder %s1360_s30, %s971_s9  ;;  %p974_p7 = scmp.lt.s32.totalorder %s972_s8, %s966_s22 }
  0x5e   : > { %295 = vadd.xlane.f32.xlu1 %v282_v16  ;;  %293 = vadd.xlane.f32.xlu0 %v281_v17  ;;  %p969_p10 = pneg %p968_p12 }
  0x5f   : > { %p975_p9 = por %p974_p7, %p973_p5 }
  0x61   : > { %p976_p11 = pnand %p975_p9, %p969_p10 }
  0x62   : > { %299 = vadd.xlane.f32.xlu1 %v284_v22  ;;  %297 = vadd.xlane.f32.xlu0 %v283_v23 }
  0xe3   : > { %v290_v31 = vpop.xlane.xlu1 %289  ;;  %v286_v32 = vpop.xlane.xlu0 %285 }
  0xe4   : > { %v303_v41 = vmul.f32 0.0078125, %v290_v31  ;;  %v301_v42 = vmul.f32 0.0078125, %v286_v32 }
  0xe6   : > { %v340_v50 = vrot.slane %v303_v41, %v328_v40  ;;  %v329_v51 = vrot.slane %v301_v42, %v328_v40 }
  0xe7   : > { %v292_v35 = vpop.xlane.xlu1 %291  ;;  %v288_v36 = vpop.xlane.xlu0 %287 }
  0xe8   : > { %v304_v38 = vmul.f32 0.0078125, %v292_v35  ;;  %v302_v39 = vmul.f32 0.0078125, %v288_v36 }
  0xea   : > { %v344_v46 = vrot.slane %v304_v38, %v333_v37  ;;  %v334_v47 = vrot.slane %v302_v39, %v333_v37 }
  0xeb   : > { %v296_v43 = vpop.xlane.xlu1 %295  ;;  %v294_v45 = vpop.xlane.xlu0 %293 }
  0xec   : > { %v306_v44 = vmul.f32 0.0078125, %v296_v43  ;;  %v305_v48 = vmul.f32 0.0078125, %v294_v45  ;;  %v345_v56 = vsel %vm335_vm1, %v344_v46, %v340_v50  ;;  %v336_v57 = vsel %vm335_vm1, %v334_v47, %v329_v51 }
  0xed   : > { %v365_v62 = vsel %vm364_vm2, %v345_v56, %v336_v57  ;;  %v562_v47 = vsub.s32 1, %v1316_v34  ;;  %v584_v51 = vsub.s32 3, %v1316_v34 }
  0xee   : > { %v353_v49 = vrot.slane %v306_v44, %v333_v37  ;;  %v349_v52 = vrot.slane %v305_v48, %v328_v40  ;;  %v551_v44 = vsub.s32 0, %v1316_v34 }
  0xef   : > { %v300_v53 = vpop.xlane.xlu1 %299  ;;  %v298_v55 = vpop.xlane.xlu0 %297 }
  0xf0   : > { %v308_v54 = vmul.f32 0.0078125, %v300_v53  ;;  %v307_v58 = vmul.f32 0.0078125, %v298_v55  ;;  %v354_v59 = vsel %vm335_vm1, %v353_v49, %v349_v52  ;;  %v573_v49 = vsub.s32 2, %v1316_v34 }
  0xf1   : > { %v367_v3 = vsel %vm366_vm3, %v354_v59, %v365_v62 }
  0xf2   : > { %v362_v60 = vrot.slane %v308_v54, %v333_v37  ;;  %v358_v61 = vrot.slane %v307_v58, %v328_v40 }
  0xf4   : > { %v363_v63 = vsel %vm335_vm1, %v362_v60, %v358_v61 }
  0xf5   : > { %v369_v7 = vsel %vm368_vm4, %v363_v63, %v367_v3 }
  0xf6   : > { %830 = vmatmul.mubr.msk.f32.vlgmr.msra.gmra.mrb[0].mxu0 %vm370_vm5, %v369_v7 }
 0x1c9   : > { %v439_v16 = vpop.f32.mrb[0].mxu0 }
 0x1ca   : > { %v440_v17 = vadd.f32 %v804_v11, %v439_v16  ;;  %v831_v22 = vpop.f32.mrb[1].mxu0 }
 0x1cc   : > { %v443_v23 = vmax.f32 %v440_v17, 0.0 }
 0x1ce   : > { %835 = vmatmul.mubr.msk.f32.vlgmr.msra.gmra.mrb[0].mxu1 %vm450_vm6, %v443_v23 }
 0x2a1   : > { %v520_v25 = vpop.f32.mrb[0].mxu1 }
 0x2a2   : > { %v521_v26 = vadd.f32 %v806_v24, %v520_v25  ;;  %v836_v27 = vpop.f32.mrb[1].mxu1 }
 0x2a4   : > { %525 = vrot.lane.b32.xlu0 %v521_v26, %s1045_s14 }
 0x316   : > { %v526_v28 = vpop.permute.xlu0 %525 }
 0x317   : > { %v528_v29 = vmax.f32 %v521_v26, %v526_v28 }
 0x319   : > { %533 = vrot.lane.b32.xlu1 %v528_v29, %s1046_s11  ;;  %v529_v35 = vsub.f32 %v521_v26, %v528_v29 }
 0x31b   : > { %v530_v36 = vmul.f32 1.442695, %v529_v35 }
 0x38b   : > { %v534_v30 = vpop.permute.xlu1 %533 }
 0x38c   : > { %v536_v31 = vsub.f32 %v521_v26, %v534_v30 }
 0x38e   : > { %v537_v32 = vmul.f32 1.442695, %v536_v31 }
 0x390   : > { %900 = vpow2.f32 %v537_v32 }
 0x391   : > { %902 = vpow2.f32 %v530_v36 }
 0x39a   : > { %v901_v33 = vpop.eup %900 }
 0x39b   : > { %540 = vrot.lane.b32.xlu1 %v901_v33, %s1045_s14  ;;  %v903_v37 = vpop.eup %902 }
 0x40d   : > { %v541_v38 = vpop.permute.xlu1 %540 }
 0x40e   : > { %v543_v39 = vadd.f32 %v903_v37, %v541_v38 }
 0x410   : > { %904 = vrcp.f32 %v543_v39 }
 0x41a   : > { %v905_v40 = vpop.eup %904 }
 0x41b   : > { %v545_v41 = vmul.f32 %v905_v40, %v543_v39 }
 0x41d   : > { %v546_v42 = vsub.f32 2.0, %v545_v41 }
 0x41f   : > { %v547_v43 = vmul.f32 %v905_v40, %v546_v42 }
 0x421   : > { %594 = vrot.lane.b32.xlu1 %v547_v43, %s1046_s11  ;;  %v548_v45 = vmul.f32 %v903_v37, %v547_v43 }
 0x423   : > { %v552_v46 = vrot.slane %v548_v45, %v551_v44  ;;  %v563_v48 = vrot.slane %v548_v45, %v562_v47  ;;  %v574_v50 = vrot.slane %v548_v45, %v573_v49  ;;  %v585_v52 = vrot.slane %v548_v45, %v584_v51 }
 0x425   : > { %558 = vbcast.lane.b32.xlu1 %v552_v46, 264  ;;  %554 = vbcast.lane.b32.xlu0 %v552_v46, 256 }
 0x429   : > { %569 = vbcast.lane.b32.xlu1 %v563_v48, 264  ;;  %565 = vbcast.lane.b32.xlu0 %v563_v48, 256 }
 0x42d   : > { %580 = vbcast.lane.b32.xlu1 %v574_v50, 264  ;;  %576 = vbcast.lane.b32.xlu0 %v574_v50, 256 }
 0x431   : > { %591 = vbcast.lane.b32.xlu1 %v585_v52, 264  ;;  %587 = vbcast.lane.b32.xlu0 %v585_v52, 256 }
 0x493   : > { %v595_v53 = vpop.permute.xlu1 %594 }
 0x494   : > { %v597_v54 = vmul.f32 %v901_v33, %v595_v53 }
 0x496   : > { %v601_v55 = vrot.slane %v597_v54, %v551_v44  ;;  %v613_v56 = vrot.slane %v597_v54, %v562_v47  ;;  %v625_v57 = vrot.slane %v597_v54, %v573_v49  ;;  %v637_v58 = vrot.slane %v597_v54, %v584_v51 }
 0x497   : > { %v559_v34 = vpop.permute.xlu1 %558  ;;  %v555_v59 = vpop.permute.xlu0 %554 }
 0x498   : > { %608 = vbcast.lane.b32.xlu1 %v601_v55, 280  ;;  %604 = vbcast.lane.b32.xlu0 %v601_v55, 272  ;;  %v647_v16 = vmul.f32 %v559_v34, %v1274_v8  ;;  %v646_v17 = vmul.f32 %v555_v59, %v1260_v2 }
 0x49b   : > { %v570_v60 = vpop.permute.xlu1 %569  ;;  %v566_v61 = vpop.permute.xlu0 %565 }
 0x49c   : > { %620 = vbcast.lane.b32.xlu1 %v613_v56, 280  ;;  %616 = vbcast.lane.b32.xlu0 %v613_v56, 272  ;;  %v649_v28 = vmul.f32 %v570_v60, %v1267_v5  ;;  %v648_v29 = vmul.f32 %v566_v61, %v1255_v0 }
 0x49f   : > { %v581_v62 = vpop.permute.xlu1 %580  ;;  %v577_v63 = vpop.permute.xlu0 %576 }
 0x4a0   : > { %632 = vbcast.lane.b32.xlu1 %v625_v57, 280  ;;  %628 = vbcast.lane.b32.xlu0 %v625_v57, 272  ;;  %v651_v0 = vmul.f32 %v581_v62, %v1283_v12  ;;  %v650_v31 = vmul.f32 %v577_v63, %v1288_v14 }
 0x4a3   : > { %v592_v3 = vpop.permute.xlu1 %591  ;;  %v588_v7 = vpop.permute.xlu0 %587 }
 0x4a4   : > { %644 = vbcast.lane.b32.xlu1 %v637_v58, 280  ;;  %640 = vbcast.lane.b32.xlu0 %v637_v58, 272  ;;  %v653_v12 = vmul.f32 %v592_v3, %v1297_v18  ;;  %v652_v14 = vmul.f32 %v588_v7, %v1302_v20 }
 0x50a   : > { %v609_v10 = vpop.permute.xlu1 %608  ;;  %v605_v11 = vpop.permute.xlu0 %604 }
 0x50b   : > { %v655_v22 = vmul.f32 %v609_v10, %v1276_v9  ;;  %v654_v23 = vmul.f32 %v605_v11, %v1264_v4 }
 0x50d   : > { %v663_v24 = vadd.f32 %v655_v22, %v647_v16  ;;  %v662_v25 = vadd.f32 %v654_v23, %v646_v17 }
 0x50e   : > { %v621_v26 = vpop.permute.xlu1 %620  ;;  %v617_v27 = vpop.permute.xlu0 %616 }
 0x50f   : > { %671 = vst [vmem:[%s1344_s23 + $0x8] sm:$0xff] %v663_v24  ;;  %670 = vst [vmem:[%s1344_s23] sm:$0xff] %v662_v25  ;;  %v657_v2 = vmul.f32 %v621_v26, %v1269_v6  ;;  %v656_v4 = vmul.f32 %v617_v27, %v1257_v1 }
 0x511   : > { %v665_v8 = vadd.f32 %v657_v2, %v649_v28  ;;  %v664_v9 = vadd.f32 %v656_v4, %v648_v29 }
 0x512   : > { %v633_v30 = vpop.permute.xlu1 %632  ;;  %v629_v5 = vpop.permute.xlu0 %628 }
 0x513   : > { %673 = vst [vmem:[%s1344_s23 + $0x18] sm:$0xff] %v665_v8  ;;  %672 = vst [vmem:[%s1344_s23 + $0x10] sm:$0xff] %v664_v9  ;;  %v659_v32 = vmul.f32 %v633_v30, %v1285_v13  ;;  %v658_v33 = vmul.f32 %v629_v5, %v1290_v15 }
 0x515   : > { %v667_v6 = vadd.f32 %v659_v32, %v651_v0  ;;  %v666_v1 = vadd.f32 %v658_v33, %v650_v31 }
 0x516   : > { %v645_v35 = vpop.permute.xlu1 %644  ;;  %v641_v36 = vpop.permute.xlu0 %640 }
 0x517   : > { %675 = vst [vmem:[%s1344_s23 + $0x28] sm:$0xff] %v667_v6  ;;  %674 = vst [vmem:[%s1344_s23 + $0x20] sm:$0xff] %v666_v1  ;;  %v661_v13 = vmul.f32 %v645_v35, %v1299_v19  ;;  %v660_v15 = vmul.f32 %v641_v36, %v1304_v21 }
 0x519   : > { %v669_v37 = vadd.f32 %v661_v13, %v653_v12  ;;  %v668_v18 = vadd.f32 %v660_v15, %v652_v14 }
 0x51b   : > { %677 = vst [vmem:[%s1344_s23 + $0x38] sm:$0xff] %v669_v37  ;;  %676 = vst [vmem:[%s1344_s23 + $0x30] sm:$0xff] %v668_v18 }
 0x51c   : > { %979 = shalt.err (!%p976_p11)
}
 0x51d   : > { %s980_s25 = scalar_lea.hbm %s1369_s26, 1024  ;;  %s984_s12 = scalar_lea.hbm %s1419_s4, 2048 }
 0x51e   : > { %p981_p3 = scmp.ne.s32.totalorder %s1369_s26, %s980_s25  ;;  %p985_p2 = scmp.lt.u32.totalorder %s1369_s26, %s1419_s4 }
 0x51f   : > { %p986_p4 = scmp.lt.u32.totalorder %s984_s12, %s980_s25  ;;  %p988_p13 = scmp.lt.u32.totalorder %s980_s25, %s1369_s26 }
 0x520   : > { %p982_p8 = pnand %p981_p3, %p1429_p1 }
 0x521   : > { %p987_p6 = por %p986_p4, %p985_p2 }
 0x522   : > { %p983_p0 = pneg %p982_p8 }
 0x523   : > { %p989_p12 = por %p988_p13, %p987_p6 }
 0x525   : > { %p990_p10 = pnand %p989_p12, %p983_p0 }
 0x527   : > { %993 = shalt.err (!%p990_p10)
}
 0x528   : > { %s1048_s23 = smov 128   ;;  %s1049_s29 = smov 8  }
 0x529   : > { %844 = dma.vmem_to_hbm [thread:$0]  (%p1429_p1), %s1360_s30, 1024, %s1369_s26, %s679_s20, %s1048_s23, %s1048_s23, %s1049_s29  }
 0x52a PF: > { %s708_s13 = sand.u32 1, %s1024_s15   ;;  %p1430_p5 = scmp.ne.s32.totalorder %s1425_s28, 0 }
 0x52b   : > { %p1431_p7 = scmp.ge.s32.totalorder %s1036_s18, 2  ;;  %s709_s19 = scalar_lea.sflag [#allocation4], %s708_s13 }
 0x52d   : > { %p854_p9 = pnand %p1431_p7, %p1430_p5 }
 0x52f   : > { %1019 = dma.done.wait (!%p854_p9), %s709_s19, 1024  }
 0x530   : > { %1021 = vsyncadd (!%p854_p9), %s709_s19, 4294966272  ;;  %p20_p11 = scmp.ge.s32.totalorder %s1100_s21, 4   ;;  %s1432_s15 = smov %s1028_s16 }
 0x531   : > { %s1433_s16 = smov %s1032_s17  ;;  %s1434_s17 = smov %s1112_s24 }
 0x532   : > { %s1435_s18 = smov %s1100_s21  ;;  %22 = sbr.rel (!%p20_p11) target bundleno = 7 (0x7), region = 94 }
 0x539   :  { %714 = vsyncpa [#allocation3], 1 }
 0x53a   :  { %716 = vsyncpa [#allocation3 + $0x1], 1 }
 0x53b   :  { %717 = vsyncpa [#allocation6], 1 }
 0x53c   :  { %719 = vsyncpa [#allocation6 + $0x1], 1 }
 0x53d   :  { %720 = vsyncpa [#allocation4], 1 }
 0x53e   :  { %722 = vsyncpa [#allocation4 + $0x1], 1 }

</bundles_post_ra>
